<compile_context>
chip_gen: v5e
topology: v5e:2x2
jax: 0.10.0
libtpu: 0.0.40
codegen_flags: <defaults>
</compile_context>

<pallas_src>
import jax
import jax.numpy as jnp
from jax.experimental import pallas as pl
from jax.experimental.pallas import tpu as pltpu

H = 512  # hidden width from the reference module


def _round_up(x, m):
    return (x + m - 1) // m * m


def _ceil_div(x, m):
    return -(-x // m)


def transition_net_kernel(s_ref, a_ref, w1_ref, b1_ref, w2_ref, b2_ref,
                          out_ref, xs_ref):
    """Fused MLP with in-kernel concat:

        xs     = [s | a]                       (bf16 VMEM scratch)
        hidden = relu(xs @ W1 + b1)            (f32 accumulation)
        out    = hidden @ W2 + b2              (stored unpadded, f32)

    s_ref   : (tm, state_dim)            bf16 VMEM
    a_ref   : (tm, action_dim)           bf16 VMEM
    w1_ref  : (state_dim+action_dim, H)  bf16 VMEM
    b1_ref  : (1, H)                     f32  VMEM
    w2_ref  : (H, state_dim)             bf16 VMEM
    b2_ref  : (1, state_dim)             f32  VMEM
    out_ref : (tm, state_dim)            f32  VMEM
    xs_ref  : (tm, state_dim+action_dim) bf16 VMEM scratch
    """
    sd = s_ref.shape[1]

    # Fused concat: place s and a side by side so the first layer is a single
    # MXU dot (one weight push, no partial-accumulator add).
    xs_ref[:, :sd] = s_ref[...]
    xs_ref[:, sd:] = a_ref[...]

    hidden = jnp.dot(xs_ref[...], w1_ref[...],
                     preferred_element_type=jnp.float32)
    hidden = jnp.maximum(hidden + b1_ref[...], 0.0)

    out = jnp.dot(hidden.astype(jnp.bfloat16), w2_ref[...],
                  preferred_element_type=jnp.float32)
    out_ref[...] = (out + b2_ref[...]).astype(out_ref.dtype)


def transition_net_forward(s, a, params, *, batch_tile=1024):
    """Wrapper: pick a balanced batch tile, pad, run the fused kernel."""
    w1, b1, w2, b2 = params
    B, state_dim = s.shape
    _, action_dim = a.shape
    sa_dim = state_dim + action_dim

    # bf16 matmul operands; halves input-side DMA and avoids in-kernel casts.
    s = s.astype(jnp.bfloat16)
    a = a.astype(jnp.bfloat16)

    # Batch tiling: balanced tiles (no mostly-empty last tile), capped at
    # `batch_tile`; force >= 2 grid steps for large batches so the "parallel"
    # grid axis can use both TensorCores on v7x (no-op on v5e/v6e).
    b_pad8 = _round_up(B, 8)
    n_tiles = max(1, _ceil_div(b_pad8, batch_tile))
    if n_tiles == 1 and b_pad8 >= 1024:
        n_tiles = 2
    tm = _round_up(_ceil_div(b_pad8, n_tiles), 8)
    b_pad = tm * n_tiles

    if b_pad != B:
        s = jnp.pad(s, ((0, b_pad - B), (0, 0)))
        a = jnp.pad(a, ((0, b_pad - B), (0, 0)))

    # NOTE: weight/bias BlockSpecs have constant index_maps; default 2-deep
    # buffering costs <0.1 MiB here, so pipeline_mode tweaks are skipped.
    out = pl.pallas_call(
        transition_net_kernel,
        out_shape=jax.ShapeDtypeStruct((b_pad, state_dim), jnp.float32),
        grid_spec=pltpu.PrefetchScalarGridSpec(
            num_scalar_prefetch=0,
            grid=(n_tiles,),
            in_specs=[
                pl.BlockSpec((tm, state_dim), lambda i: (i, 0)),
                pl.BlockSpec((tm, action_dim), lambda i: (i, 0)),
                pl.BlockSpec((sa_dim, H), lambda i: (0, 0)),
                pl.BlockSpec((1, H), lambda i: (0, 0)),
                pl.BlockSpec((H, state_dim), lambda i: (0, 0)),
                pl.BlockSpec((1, state_dim), lambda i: (0, 0)),
            ],
            out_specs=pl.BlockSpec((tm, state_dim), lambda i: (i, 0)),
            scratch_shapes=[pltpu.VMEM((tm, sa_dim), jnp.bfloat16)],
        ),
        compiler_params=pltpu.CompilerParams(
            dimension_semantics=("parallel",)),  # 2x on v7x dual TensorCores
    )(s, a, w1, b1, w2, b2)

    return out[:B]


def init_params(key, state_dim, action_dim):
    """Deterministic synthetic parameters (shapes match the torch module).

    W1 is the combined (state_dim+action_dim, H) matrix (concat fused into
    the kernel via a VMEM scratch). Matmul operands are bf16; biases f32.
    """
    k1, k2, k3, k4 = jax.random.split(key, 4)
    w1 = (jax.random.normal(k1, (state_dim + action_dim, H), jnp.float32)
          * 0.05).astype(jnp.bfloat16)
    b1 = jax.random.normal(k2, (1, H), jnp.float32) * 0.01
    w2 = (jax.random.normal(k3, (H, state_dim), jnp.float32)
          * 0.05).astype(jnp.bfloat16)
    b2 = jax.random.normal(k4, (1, state_dim), jnp.float32) * 0.01
    return w1, b1, w2, b2


def reference_forward(s, a, params):
    """Plain-JAX reference with the same bf16-operand / f32-accum math."""
    w1, b1, w2, b2 = params
    x = jnp.concatenate([s, a], axis=1).astype(jnp.bfloat16)
    hidden = jnp.dot(x, w1, preferred_element_type=jnp.float32) + b1
    hidden = jnp.maximum(hidden, 0.0)
    return jnp.dot(hidden.astype(jnp.bfloat16), w2,
                   preferred_element_type=jnp.float32) + b2


if __name__ == "__main__":
    batch = 8
    state_dim = 16
    action_dim = 8

    key = jax.random.PRNGKey(0)
    ks, ka, kp = jax.random.split(key, 3)
    s = jax.random.normal(ks, (batch, state_dim), jnp.float32)
    a = jax.random.normal(ka, (batch, action_dim), jnp.float32)
    params = init_params(kp, state_dim, action_dim)

    out = transition_net_forward(s, a, params)
    out = jax.block_until_ready(out)

    ref = reference_forward(s, a, params)
    assert out.shape == (batch, state_dim)
    # bf16 matmul operands -> loosened tolerance vs an f32-only version.
    assert jnp.allclose(out, ref, atol=2e-2, rtol=2e-2), "mismatch vs reference"

    # TODO(synk): l2 + dropout path omitted because intermediate_layer=False
    # in the reference module (forward never executes it).

    print("KERNEL_OK")
</pallas_src>

<mosaic_0001>
module attributes {stable_mosaic.version = 11 : i64} {
  func.func @transition_net_kernel(%arg0: i32, %arg1: memref<8x16xbf16, #tpu.memory_space<vmem>>, %arg2: memref<8x8xbf16, #tpu.memory_space<vmem>>, %arg3: memref<24x512xbf16, #tpu.memory_space<vmem>>, %arg4: memref<1x512xf32, #tpu.memory_space<vmem>>, %arg5: memref<512x16xbf16, #tpu.memory_space<vmem>>, %arg6: memref<1x16xf32, #tpu.memory_space<vmem>>, %arg7: memref<8x16xf32, #tpu.memory_space<vmem>>, %arg8: memref<8x24xbf16, #tpu.memory_space<vmem>>) attributes {dimension_semantics = [#tpu.dimension_semantics<parallel>], iteration_bounds = array<i64: 1>, scalar_prefetch = 0 : i64, scratch_operands = 1 : i64, tpu.core_type = #tpu.core_type<tc>, window_params = [{transform_indices = @transform_0, window_bounds = array<i64: 8, 16>}, {transform_indices = @transform_1, window_bounds = array<i64: 8, 8>}, {pipeline_mode = #tpu.pipeline_mode<synchronous>, transform_indices = @transform_2, window_bounds = array<i64: 24, 512>}, {pipeline_mode = #tpu.pipeline_mode<synchronous>, transform_indices = @transform_3, window_bounds = array<i64: 1, 512>}, {pipeline_mode = #tpu.pipeline_mode<synchronous>, transform_indices = @transform_4, window_bounds = array<i64: 512, 16>}, {pipeline_mode = #tpu.pipeline_mode<synchronous>, transform_indices = @transform_5, window_bounds = array<i64: 1, 16>}, {transform_indices = @transform_6, window_bounds = array<i64: 8, 16>}]} {
    %c0 = arith.constant 0 : index
    %c0_0 = arith.constant 0 : index
    %0 = vector.load %arg1[%c0, %c0_0] : memref<8x16xbf16, #tpu.memory_space<vmem>>, vector<8x16xbf16>
    %c0_1 = arith.constant 0 : index
    %c0_2 = arith.constant 0 : index
    %1 = vector.load %arg8[%c0_1, %c0_2] : memref<8x24xbf16, #tpu.memory_space<vmem>>, vector<8x16xbf16>
    tpu.vector_store %arg8[%c0_1, %c0_2], %0 {strides = array<i32>} : memref<8x24xbf16, #tpu.memory_space<vmem>>, vector<8x16xbf16>,
    %c0_3 = arith.constant 0 : index
    %c0_4 = arith.constant 0 : index
    %2 = vector.load %arg2[%c0_3, %c0_4] : memref<8x8xbf16, #tpu.memory_space<vmem>>, vector<8x8xbf16>
    %c0_5 = arith.constant 0 : index
    %c16 = arith.constant 16 : index
    %3 = vector.load %arg8[%c0_5, %c16] : memref<8x24xbf16, #tpu.memory_space<vmem>>, vector<8x8xbf16>
    tpu.vector_store %arg8[%c0_5, %c16], %2 {strides = array<i32>} : memref<8x24xbf16, #tpu.memory_space<vmem>>, vector<8x8xbf16>,
    %c0_6 = arith.constant 0 : index
    %c0_7 = arith.constant 0 : index
    %4 = vector.load %arg8[%c0_6, %c0_7] : memref<8x24xbf16, #tpu.memory_space<vmem>>, vector<8x24xbf16>
    %c0_8 = arith.constant 0 : index
    %c0_9 = arith.constant 0 : index
    %5 = vector.load %arg3[%c0_8, %c0_9] : memref<24x512xbf16, #tpu.memory_space<vmem>>, vector<24x512xbf16>
    %cst = arith.constant dense<0.000000e+00> : vector<8x512xf32>
    %6 = tpu.matmul %4, %5, %cst {dimension_numbers = #tpu.dot_dimension_numbers<[1], [0], [0], [1], [0, 0, 1, 1], [], []>} : vector<8x24xbf16>, vector<24x512xbf16>, vector<8x512xf32> -> vector<8x512xf32>
    %c0_10 = arith.constant 0 : index
    %c0_11 = arith.constant 0 : index
    %7 = vector.load %arg4[%c0_10, %c0_11] : memref<1x512xf32, #tpu.memory_space<vmem>>, vector<1x512xf32>
    %8 = vector.broadcast %7 : vector<1x512xf32> to vector<8x512xf32>
    %9 = arith.addf %6, %8 : vector<8x512xf32>
    %cst_12 = arith.constant 0.000000e+00 : f32
    %10 = vector.broadcast %cst_12 : f32 to vector<8x512xf32>
    %11 = arith.maximumf %9, %10 : vector<8x512xf32>
    %12 = arith.truncf %11 : vector<8x512xf32> to vector<8x512xbf16>
    %c0_13 = arith.constant 0 : index
    %c0_14 = arith.constant 0 : index
    %13 = vector.load %arg5[%c0_13, %c0_14] : memref<512x16xbf16, #tpu.memory_space<vmem>>, vector<512x16xbf16>
    %cst_15 = arith.constant dense<0.000000e+00> : vector<8x16xf32>
    %14 = tpu.matmul %12, %13, %cst_15 {dimension_numbers = #tpu.dot_dimension_numbers<[1], [0], [0], [1], [0, 0, 1, 1], [], []>} : vector<8x512xbf16>, vector<512x16xbf16>, vector<8x16xf32> -> vector<8x16xf32>
    %c0_16 = arith.constant 0 : index
    %c0_17 = arith.constant 0 : index
    %15 = vector.load %arg6[%c0_16, %c0_17] : memref<1x16xf32, #tpu.memory_space<vmem>>, vector<1x16xf32>
    %16 = vector.broadcast %15 : vector<1x16xf32> to vector<8x16xf32>
    %17 = arith.addf %14, %16 : vector<8x16xf32>
    %c0_18 = arith.constant 0 : index
    %c0_19 = arith.constant 0 : index
    %18 = vector.load %arg7[%c0_18, %c0_19] : memref<8x16xf32, #tpu.memory_space<vmem>>, vector<8x16xf32>
    tpu.vector_store %arg7[%c0_18, %c0_19], %17 {strides = array<i32>} : memref<8x16xf32, #tpu.memory_space<vmem>>, vector<8x16xf32>,
    return
  }
  func.func @transform_0(%arg0: i32) -> (i32, i32) {
    %c0_i32 = arith.constant 0 : i32
    %c0_i32_0 = arith.constant 0 : i32
    return %arg0, %c0_i32 : i32, i32
  }
  func.func @transform_1(%arg0: i32) -> (i32, i32) {
    %c0_i32 = arith.constant 0 : i32
    %c0_i32_0 = arith.constant 0 : i32
    return %arg0, %c0_i32 : i32, i32
  }
  func.func @transform_2(%arg0: i32) -> (i32, i32) {
    %c0_i32 = arith.constant 0 : i32
    %c0_i32_0 = arith.constant 0 : i32
    %c0_i32_1 = arith.constant 0 : i32
    return %c0_i32, %c0_i32_0 : i32, i32
  }
  func.func @transform_3(%arg0: i32) -> (i32, i32) {
    %c0_i32 = arith.constant 0 : i32
    %c0_i32_0 = arith.constant 0 : i32
    %c0_i32_1 = arith.constant 0 : i32
    return %c0_i32, %c0_i32_0 : i32, i32
  }
  func.func @transform_4(%arg0: i32) -> (i32, i32) {
    %c0_i32 = arith.constant 0 : i32
    %c0_i32_0 = arith.constant 0 : i32
    %c0_i32_1 = arith.constant 0 : i32
    return %c0_i32, %c0_i32_0 : i32, i32
  }
  func.func @transform_5(%arg0: i32) -> (i32, i32) {
    %c0_i32 = arith.constant 0 : i32
    %c0_i32_0 = arith.constant 0 : i32
    %c0_i32_1 = arith.constant 0 : i32
    return %c0_i32, %c0_i32_0 : i32, i32
  }
  func.func @transform_6(%arg0: i32) -> (i32, i32) {
    %c0_i32 = arith.constant 0 : i32
    %c0_i32_0 = arith.constant 0 : i32
    return %arg0, %c0_i32 : i32, i32
  }
}

</mosaic_0001>

<bundles_post_ra>
// kernel: tpu_custom_call.1
= control target key start
LH: loop header
LB: loop body
LE: loop exit
PB: predicated region body
PF: predicated region fallthrough
CT: control target
= control target key end

     0   :  { %vm26_vm0 = vcmask 125952   ;;  %s702_s25 = smov 16   ;;  %s880_s0 = inlined_call_operand.vmem [shape: bf16[8,16], index: 0, kind: input, shape index: {}]   ;;  %s881_s1 = inlined_call_operand.vmem [shape: bf16[8,8], index: 1, kind: input, shape index: {}]   ;;  %s882_s2 = inlined_call_operand.vmem [shape: bf16[24,512], index: 2, kind: input, shape index: {}]   ;;  %s883_s3 = inlined_call_operand.vmem [shape: f32[1,512], index: 3, kind: input, shape index: {}]   ;;  %s884_s4 = inlined_call_operand.vmem [shape: bf16[512,16], index: 4, kind: input, shape index: {}]   ;;  %s885_s5 = inlined_call_operand.vmem [shape: f32[1,16], index: 5, kind: input, shape index: {}]   ;;  %s886_s6 = inlined_call_operand.hbm [shape: f32[8,16], index: 6, kind: output, shape index: {}]  }
   0x1   :  { %v28_v0 = vld [vmem:[%s881_s1] sm:$0xf] }
   0x2   :  { %v25_v1 = vld [vmem:[%s880_s0] sm:$0xf]  ;;  %30 = vrot.lane.b32.xlu0 %v28_v0, %s702_s25 }
   0x3   :  { %27 = vst.msk [vmem:[#allocation2] sm:$0xf] %vm26_vm0, %v25_v1 }
   0x4   :  { %11 = vsyncpa [#allocation4], 0  ;;  %v40_v2 = vld [vmem:[%s882_s2 + $0x20] sm:$0xff]  ;;  %v41_v3 = vld [vmem:[%s882_s2 + $0x28] sm:$0xff]  ;;  %vm86_vm1 = vcmask 1043456   ;;  %vm33_vm2 = vcmask 191616  }
   0x5   :  { %v66_v4 = vunpack.c.l.b16 %v40_v2  ;;  %v67_v5 = vunpack.c.h.b16 %v40_v2  ;;  %v68_v6 = vunpack.c.l.b16 %v41_v3  ;;  %v69_v7 = vunpack.c.h.b16 %v41_v3  ;;  %v491_v16 = vld [vmem:[%s882_s2] sm:$0xf]  ;;  %v639_v17 = vld [vmem:[%s882_s2 + $0xc] sm:$0xf0]  ;;  %v637_v18 = vld [vmem:[%s882_s2 + $0x4] sm:$0xf] }
   0x6   :  { %v493_v19 = vld [vmem:[%s882_s2 + $0x10] sm:$0xf0]  ;;  %v492_v20 = vor.u32 %v639_v17, %v491_v16  ;;  %v499_v22 = vld [vmem:[%s882_s2 + $0x8] sm:$0xf]  ;;  %v640_v23 = vld [vmem:[%s882_s2 + $0x14] sm:$0xf0] }
   0x7   :  { %v74_v8 = vpack.c.b16 %v66_v4, %v66_v4  ;;  %v75_v9 = vpack.c.b16 %v67_v5, %v67_v5  ;;  %v76_v10 = vpack.c.b16 %v68_v6, %v68_v6  ;;  %v77_v11 = vpack.c.b16 %v69_v7, %v69_v7  ;;  %v638_v24 = vld [vmem:[%s882_s2 + $0xc] sm:$0xf]  ;;  %v501_v26 = vld [vmem:[%s882_s2 + $0x18] sm:$0xf0]  ;;  %v647_v32 = vld [vmem:[%s884_s4 + $0x30] sm:$0xff]  ;;  %s703_s1 = smov [#allocation3]  }
   0x8   :  { %v496_v21 = vor.u32 %v637_v18, %v493_v19  ;;  %v500_v25 = vor.u32 %v640_v23, %v499_v22  ;;  %v504_v27 = vor.u32 %v638_v24, %v501_v26  ;;  %v648_v28 = vld [vmem:[%s884_s4 + $0x38] sm:$0xff]  ;;  %v655_v33 = vld [vmem:[%s884_s4 + $0x70] sm:$0xff]  ;;  %v646_v36 = vld [vmem:[%s884_s4 + $0x28] sm:$0xff]  ;;  %vm82_vm3 = vcmask 195584   ;;  %s478_s30 = sshll.u32 %s703_s1, 4  ;;  %s480_s9 = sshll.u32 %s886_s6, 4  ;;  %s479_s30 = int_to_ptr.vmem [resolvable:$true] %s478_s30  ;;  %s481_s9 = int_to_ptr.hbm [resolvable:$true] %s480_s9 }
   0x9   :  { %v88_v12 = vsel %vm86_vm1, %v74_v8, 0  ;;  %v91_v13 = vsel %vm86_vm1, %v75_v9, 0  ;;  %v94_v14 = vsel %vm86_vm1, %v76_v10, 0  ;;  %v97_v15 = vsel %vm86_vm1, %v77_v11, 0  ;;  %v656_v29 = vld [vmem:[%s884_s4 + $0x78] sm:$0xff]  ;;  %v663_v34 = vld [vmem:[%s884_s4 + $0xb0] sm:$0xff] }
   0xa   :  { %105 = vmatpush.bf16.msra.mxu0 %v88_v12  ;;  %118 = vmatpush.bf16.msra.mxu1 %v91_v13  ;;  %v664_v30 = vld [vmem:[%s884_s4 + $0xb8] sm:$0xff]  ;;  %v671_v35 = vld [vmem:[%s884_s4 + $0xf0] sm:$0xff]  ;;  %v654_v37 = vld [vmem:[%s884_s4 + $0x68] sm:$0xff]  ;;  %vm471_vm4 = vcmask 130048  }
   0xb   :  { %131 = vmatpush.bf16.msra.mxu2 %v94_v14  ;;  %144 = vmatpush.bf16.msra.mxu3 %v97_v15  ;;  %v672_v31 = vld [vmem:[%s884_s4 + $0xf8] sm:$0xff]  ;;  %v662_v38 = vld [vmem:[%s884_s4 + $0xa8] sm:$0xff]  ;;  %v645_v40 = vld [vmem:[%s884_s4 + $0x20] sm:$0xff] }
   0xc   :  { %v670_v39 = vld [vmem:[%s884_s4 + $0xe8] sm:$0xff]  ;;  %v653_v41 = vld [vmem:[%s884_s4 + $0x60] sm:$0xff]  ;;  %v644_v44 = vld [vmem:[%s884_s4 + $0x18] sm:$0xff] }
   0xd   :  { %v661_v42 = vld [vmem:[%s884_s4 + $0xa0] sm:$0xff]  ;;  %v652_v45 = vld [vmem:[%s884_s4 + $0x58] sm:$0xff]  ;;  %v643_v48 = vld [vmem:[%s884_s4 + $0x10] sm:$0xff] }
   0xe   :  { %106 = vmatpush.bf16.msra.mxu0 %v492_v20  ;;  %119 = vmatpush.bf16.msra.mxu1 %v496_v21  ;;  %v669_v43 = vld [vmem:[%s884_s4 + $0xe0] sm:$0xff]  ;;  %v660_v46 = vld [vmem:[%s884_s4 + $0x98] sm:$0xff]  ;;  %v651_v49 = vld [vmem:[%s884_s4 + $0x50] sm:$0xff] }
   0xf   :  { %132 = vmatpush.bf16.msra.mxu2 %v500_v25  ;;  %145 = vmatpush.bf16.msra.mxu3 %v504_v27  ;;  %v668_v47 = vld [vmem:[%s884_s4 + $0xd8] sm:$0xff]  ;;  %v642_v52 = vld [vmem:[%s884_s4 + $0x8] sm:$0xff]  ;;  %v659_v54 = vld [vmem:[%s884_s4 + $0x90] sm:$0xff] }
  0x10   :  { %v650_v53 = vld [vmem:[%s884_s4 + $0x48] sm:$0xff]  ;;  %v667_v55 = vld [vmem:[%s884_s4 + $0xd0] sm:$0xff]  ;;  %v641_v56 = vld [vmem:[%s884_s4] sm:$0xff] }
  0x11   :  { %v649_v57 = vld [vmem:[%s884_s4 + $0x40] sm:$0xff]  ;;  %v658_v58 = vld [vmem:[%s884_s4 + $0x88] sm:$0xff] }
  0x12   :  { %419 = vmatpush.bf16.msrb.mxu0 %v648_v28  ;;  %432 = vmatpush.bf16.msrb.mxu1 %v656_v29  ;;  %v666_v59 = vld [vmem:[%s884_s4 + $0xc8] sm:$0xff]  ;;  %v657_v60 = vld [vmem:[%s884_s4 + $0x80] sm:$0xff] }
  0x13   :  { %445 = vmatpush.bf16.msrb.mxu2 %v664_v30  ;;  %458 = vmatpush.bf16.msrb.mxu3 %v672_v31  ;;  %v665_v61 = vld [vmem:[%s884_s4 + $0xc0] sm:$0xff] }
  0x14   :  { %v42_v62 = vld [vmem:[%s883_s3] sm:$0xf] }
  0x15   :  { %v44_v63 = vperm.slane %v42_v62, 0  ;;  %v45_v0 = vperm.slane %v42_v62, 1  ;;  %v46_v7 = vperm.slane %v42_v62, 2  ;;  %v47_v8 = vperm.slane %v42_v62, 3  ;;  %v675_v25 = vld [vmem:[%s885_s5] ss:$0 sm:$0xff] }
  0x16   :  { %420 = vmatpush.bf16.msrb.mxu0 %v647_v32  ;;  %433 = vmatpush.bf16.msrb.mxu1 %v655_v33 }
  0x17   :  { %446 = vmatpush.bf16.msrb.mxu2 %v663_v34  ;;  %459 = vmatpush.bf16.msrb.mxu3 %v671_v35 }
  0x1a   :  { %421 = vmatpush.bf16.msrb.mxu0 %v646_v36  ;;  %434 = vmatpush.bf16.msrb.mxu1 %v654_v37 }
  0x1b   :  { %447 = vmatpush.bf16.msrb.mxu2 %v662_v38  ;;  %460 = vmatpush.bf16.msrb.mxu3 %v670_v39 }
  0x1e   :  { %422 = vmatpush.bf16.msrb.mxu0 %v645_v40  ;;  %435 = vmatpush.bf16.msrb.mxu1 %v653_v41 }
  0x1f   :  { %448 = vmatpush.bf16.msrb.mxu2 %v661_v42  ;;  %461 = vmatpush.bf16.msrb.mxu3 %v669_v43 }
  0x22   :  { %423 = vmatpush.bf16.msrb.mxu0 %v644_v44  ;;  %436 = vmatpush.bf16.msrb.mxu1 %v652_v45 }
  0x23   :  { %449 = vmatpush.bf16.msrb.mxu2 %v660_v46  ;;  %462 = vmatpush.bf16.msrb.mxu3 %v668_v47 }
  0x26   :  { %424 = vmatpush.bf16.msrb.mxu0 %v643_v48  ;;  %437 = vmatpush.bf16.msrb.mxu1 %v651_v49 }
  0x27   :  { %450 = vmatpush.bf16.msrb.mxu2 %v659_v54  ;;  %463 = vmatpush.bf16.msrb.mxu3 %v667_v55 }
  0x2a   :  { %425 = vmatpush.bf16.msrb.mxu0 %v642_v52  ;;  %438 = vmatpush.bf16.msrb.mxu1 %v650_v53 }
  0x2b   :  { %451 = vmatpush.bf16.msrb.mxu2 %v658_v58  ;;  %464 = vmatpush.bf16.msrb.mxu3 %v666_v59 }
  0x2e   :  { %426 = vmatpush.bf16.msrb.mxu0 %v641_v56  ;;  %439 = vmatpush.bf16.msrb.mxu1 %v649_v57 }
  0x2f   :  { %452 = vmatpush.bf16.msrb.mxu2 %v657_v60  ;;  %465 = vmatpush.bf16.msrb.mxu3 %v665_v61 }
  0x74   :  { %v31_v50 = vpop.permute.xlu0 %30 }
  0x75   :  { %34 = vst.msk [vmem:[#allocation2] sm:$0xf] %vm33_vm2, %v31_v50 }
  0x7c   :  { %v35_v51 = vld [vmem:[#allocation2] sm:$0xf] }
  0x7d   :  { %505 = vmatmul.msk.bf16.vlgmr.msra.gmra.mxu0 %vm82_vm3, %v35_v51  ;;  %506 = vmatmul.msk.bf16.vlgmr.msra.gmra.mxu1 %vm82_vm3, %v35_v51 }
  0x7e   :  { %507 = vmatmul.msk.bf16.vlgmr.msra.gmra.mxu2 %vm82_vm3, %v35_v51  ;;  %508 = vmatmul.msk.bf16.vlgmr.msra.gmra.mxu3 %vm82_vm3, %v35_v51 }
  0xfa   :  { %v108_v1 = vpop.f32.mrf.mxu0  ;;  %v121_v2 = vpop.f32.mrf.mxu1 }
  0xfb   :  { %v109_v3 = vadd.f32 %v108_v1, %v44_v63  ;;  %v122_v4 = vadd.f32 %v121_v2, %v45_v0 }
  0xfd   :  { %v151_v5 = vmax.f32 %v109_v3, 0.0  ;;  %v152_v6 = vmax.f32 %v122_v4, 0.0 }
  0xff   :  { %v155_v9 = vpack.c.bf16 %v151_v5, %v151_v5  ;;  %v156_v10 = vpack.c.bf16 %v152_v6, %v152_v6 }
 0x101   :  { %v134_v11 = vpop.f32.mrf.mxu2  ;;  %v147_v12 = vpop.f32.mrf.mxu3  ;;  %427 = vmatmul.bf16.vlgmr.msrb.gmra.mxu0 %v155_v9  ;;  %440 = vmatmul.bf16.vlgmr.msrb.gmra.mxu1 %v156_v10 }
 0x102   :  { %v135_v13 = vadd.f32 %v134_v11, %v46_v7  ;;  %v148_v14 = vadd.f32 %v147_v12, %v47_v8  ;;  %v110_v15 = vpop.f32.mrf.mxu0  ;;  %v123_v16 = vpop.f32.mrf.mxu1 }
 0x104   :  { %v153_v17 = vmax.f32 %v135_v13, 0.0  ;;  %v154_v18 = vmax.f32 %v148_v14, 0.0 }
 0x106   :  { %v157_v19 = vpack.c.bf16 %v153_v17, %v153_v17  ;;  %v158_v20 = vpack.c.bf16 %v154_v18, %v154_v18 }
 0x108   :  { %453 = vmatmul.bf16.vlgmr.msrb.gmra.mxu2 %v157_v19  ;;  %466 = vmatmul.bf16.vlgmr.msrb.gmra.mxu3 %v158_v20 }
 0x109   :  { %v136_v21 = vpop.f32.mrf.mxu2  ;;  %v149_v22 = vpop.f32.mrf.mxu3 }
 0x17e   :  { %v428_v23 = vpop.f32.mrf.mxu0  ;;  %v441_v24 = vpop.f32.mrf.mxu1 }
 0x17f   :  { %v429_v26 = vadd.f32 %v675_v25, %v428_v23 }
 0x181   :  { %v442_v29 = vadd.f32 %v441_v24, %v429_v26 }
 0x186   :  { %v430_v27 = vpop.f32.mrf.mxu0  ;;  %v443_v28 = vpop.f32.mrf.mxu1 }
 0x18b   :  { %v454_v30 = vpop.f32.mrf.mxu2  ;;  %v467_v31 = vpop.f32.mrf.mxu3 }
 0x18c   :  { %v455_v32 = vadd.f32 %v454_v30, %v442_v29 }
 0x18e   :  { %v468_v33 = vadd.f32 %v467_v31, %v455_v32 }
 0x190   :  { %472 = vst.msk [vmem:[#allocation3] sm:$0xff] %vm471_vm4, %v468_v33 }
 0x191   :  { %483 = dma.vmem_to_hbm [thread:$0]  %s479_s30, 128, %s481_s9, [#allocation4]  }
 0x193   :  { %v456_v34 = vpop.f32.mrf.mxu2  ;;  %v469_v35 = vpop.f32.mrf.mxu3 }
 0x194   :  { %700 = dma.done.wait [#allocation4], 128  }
 0x195   :  { %701 = vsyncadd [#allocation4], 4294967168 }
 0x196   :  { %488 = vsyncpa [#allocation4], 1 }

</bundles_post_ra>
